<compile_context>
chip_gen: v6e
topology: v6e:2x2x1
jax: 0.10.0
libtpu: 0.0.40
codegen_flags: <defaults>
</compile_context>

<pallas_src>
import jax
import jax.numpy as jnp
import numpy as np
from jax import lax
from jax.experimental import pallas as pl
from jax.experimental.pallas import tpu as pltpu


# ----------------------------------------------------------------------------- #
# Shape heuristics
# ----------------------------------------------------------------------------- #
def _pick_wp(H, W):
    """Canvas width: >= W+6 (halo 3+3) and, if cheap, H*Wp a multiple of 128 so the
    output store is lane-dense (unmasked)."""
    base = W + 6
    cap = max(2 * base, base + 8)
    for wp in range(base, base + 129):
        if (H * wp) % 128 == 0 and wp <= cap:
            return wp
    return base  # TODO(synk): masked (non-128) output store fallback


def _pick_nb(N):
    """Images per grid step: amortise per-step overhead but keep >= 2 grid steps
    (v7x dual TensorCore)."""
    for nb in (8, 4, 2):
        if N % nb == 0 and N // nb >= 2:
            return nb
    return 1


# ----------------------------------------------------------------------------- #
# Pallas kernel factory (all shapes closed over as Python ints)
# ----------------------------------------------------------------------------- #
def _make_kernel(H, W, Wp, C1, Cq, C2, Nb):
    Hp = H + 7                     # 3-row halo top, 4-row halo bottom (1 spare row
    Pin = Hp * Wp                  # keeps every flat read of the cat stage in-bounds)
    L_A = (H + 6) * Wp             # W-branch activation length
    L_H = (H + 5) * Wp             # H-branch activation length
    HWp = H * Wp                   # output slab width (multiple of 128 when possible)
    L_S = HWp + Wp + 1             # stacked cat-conv operand length

    def silu(v):
        return v * jax.nn.sigmoid(v)

    def kernel(x_ref, wbr_ref, wcat_ref, bias_ref, mask_ref, o_ref, canvas_ref):
        f32 = jnp.float32
        # Zero-halo canvas scratch; interior rows are rewritten per image below, so a
        # single per-step memset keeps the halo at zero (safe under "parallel" grid).
        canvas_ref[...] = jnp.zeros_like(canvas_ref)

        wbr = wbr_ref[...]                      # (6*Cq, C1)  BN scale pre-folded
        wcat = wcat_ref[...]                    # (4*C2, 4*Cq) BN scale pre-folded
        bcw = bias_ref[0:Cq]                    # (Cq, 1)
        bch = bias_ref[Cq:2 * Cq]               # (Cq, 1)
        bcat = bias_ref[2 * Cq:2 * Cq + C2]     # (C2, 1)
        m0 = mask_ref[0:1, :] > 0.5             # lane is column 0 of the (H+1,W+1) grid
        mW = mask_ref[1:2, :] > 0.5             # lane is column W

        # TODO(synk): switch to lax.fori_loop(..., unroll=True) for large Nb.
        for b in range(Nb):
            # ---- build the zero-halo canvas (replaces the 4 asymmetric pads) ----
            for i in range(H):
                off = (i + 3) * Wp + 3
                canvas_ref[:, off:off + W] = x_ref[b, :, i * W:(i + 1) * W]
            xc = canvas_ref[...]                                     # (C1, Pin)

            # ---- both branch convs as ONE matmul; taps = lane shifts of the output ----
            z = jnp.dot(wbr, xc, preferred_element_type=f32)         # (6*Cq, Pin)
            aw = (z[0:Cq, 0:L_A]
                  + z[Cq:2 * Cq, 1:1 + L_A]
                  + z[2 * Cq:3 * Cq, 2:2 + L_A] + bcw)
            aw = silu(aw)                                            # (Cq, L_A)
            ah = (z[3 * Cq:4 * Cq, 0:L_H]
                  + z[4 * Cq:5 * Cq, Wp:Wp + L_H]
                  + z[5 * Cq:6 * Cq, 2 * Wp:2 * Wp + L_H] + bch)
            ah = silu(ah)                                            # (Cq, L_H)

            # ---- stacked cat-conv operand; torch.roll wraps folded into the slices ----
            # x1 = roll(yw0, +1, H): first canvas row of anchors reads row H+2 instead.
            s1 = jnp.concatenate([aw[:, (H + 2) * Wp:(H + 3) * Wp],
                                  aw[:, 2 * Wp:2 * Wp + (L_S - Wp)]], axis=1)
            # x2 = roll(yw1, -1, H): last row of anchors reads canvas row 3 instead.
            s2 = jnp.concatenate([aw[:, 4 * Wp + 3:4 * Wp + 3 + HWp],
                                  aw[:, 3 * Wp + 3:4 * Wp + 4]], axis=1)
            # x3 = roll(yh0, +1, W): column 0 reads column W (strided -> masked select).
            s3 = jnp.where(m0, ah[:, W + 3:W + 3 + L_S], ah[:, 2:2 + L_S])
            # x4 = roll(yh1, -1, W): column W reads column 0.
            s4 = jnp.where(mW, ah[:, 3 * Wp + 2 - W:3 * Wp + 2 - W + L_S],
                           ah[:, 3 * Wp + 3:3 * Wp + 3 + L_S])
            s = jnp.concatenate([s1, s2, s3, s4], axis=0)            # (4*Cq, L_S)

            # ---- 2x2 cat conv: one matmul, then shift-and-add the 4 (dh,dw) taps ----
            y = jnp.dot(wcat, s, preferred_element_type=f32)         # (4*C2, L_S)
            out = (y[0:C2, 0:HWp]
                   + y[C2:2 * C2, 1:1 + HWp]
                   + y[2 * C2:3 * C2, Wp:Wp + HWp]
                   + y[3 * C2:4 * C2, Wp + 1:Wp + 1 + HWp] + bcat)
            o_ref[b] = silu(out)                                     # lane-dense store

    return kernel, Pin, L_S


# ----------------------------------------------------------------------------- #
# Wrapper: weight re-layout (BN folded), pallas_call, NCHW crop
# ----------------------------------------------------------------------------- #
def spconv_forward(x_nchw, params):
    N, C1, H, W = x_nchw.shape
    wcw, wch, wcat = params["wcw"], params["wch"], params["wcat"]
    Cq = wcw.shape[-1]
    C2 = wcat.shape[-1]

    Wp = _pick_wp(H, W)
    Nb = _pick_nb(N)
    kernel, Pin, L_S = _make_kernel(H, W, Wp, C1, Cq, C2, Nb)
    HWp = H * Wp

    # Raw activation, lane-dense last dim (metadata-only reshape, no HBM copy).
    x_flat = x_nchw.astype(jnp.float32).reshape(N, C1, H * W)

    # Weight re-layout with BN scale folded in (done once per call in XLA).
    scw = params["scw"].reshape(Cq)
    sch = params["sch"].reshape(Cq)
    scat = params["scat"].reshape(C2)
    # rows [kw*Cq + q] for the (1,3) conv, then [3*Cq + kh*Cq + q] for the (3,1) conv
    w_w = (jnp.transpose(wcw, (0, 2, 1)) * scw[None, :, None]).reshape(3 * Cq, C1)
    w_h = (jnp.transpose(wch, (0, 2, 1)) * sch[None, :, None]).reshape(3 * Cq, C1)
    wbr_m = jnp.concatenate([w_w, w_h], axis=0).astype(jnp.float32)      # (6*Cq, C1)
    # rows [(dh*2+dw)*C2 + o], cols [branch*Cq + q]
    wcat_m = (jnp.transpose(wcat, (0, 1, 3, 2)) * scat[None, None, :, None]
              ).reshape(4 * C2, 4 * Cq).astype(jnp.float32)              # (4*C2, 4*Cq)
    # packed per-channel biases (single tiny input)
    bias_pk = jnp.concatenate([params["bcw"].reshape(Cq, 1),
                               params["bch"].reshape(Cq, 1),
                               params["bcat"].reshape(C2, 1)], axis=0).astype(jnp.float32)
    # column-wrap masks, hoisted out of the kernel (integer arithmetic, no f32 floor)
    lane = jnp.arange(L_S, dtype=jnp.int32)
    masks = jnp.stack([(lane % Wp == 0), (lane % Wp == W)]).astype(jnp.float32)

    def fixed(a):
        return pl.BlockSpec(a.shape, lambda g, _nd=a.ndim: (0,) * _nd)

    out_flat = pl.pallas_call(
        kernel,
        out_shape=jax.ShapeDtypeStruct((N, C2, HWp), jnp.float32),
        grid=(N // Nb,),
        in_specs=[
            pl.BlockSpec((Nb, C1, H * W), lambda g: (g, 0, 0)),
            fixed(wbr_m), fixed(wcat_m), fixed(bias_pk), fixed(masks),
        ],
        out_specs=pl.BlockSpec((Nb, C2, HWp), lambda g: (g, 0, 0)),
        scratch_shapes=[pltpu.VMEM((C1, Pin), jnp.float32)],
        compiler_params=pltpu.CompilerParams(
            dimension_semantics=("parallel",),
            vmem_limit_bytes=32 * 1024 * 1024),   # > v5e's 16 MiB scoped default
    )(x_flat, wbr_m, wcat_m, bias_pk, masks)

    # (C2, H*Wp) flat slab -> NCHW crop (cheap layout op in the wrapper).
    return out_flat.reshape(N, C2, H, Wp)[:, :, :, :W]


# ----------------------------------------------------------------------------- #
# Deterministic synthetic parameter init (folded eval-mode BatchNorm)
# ----------------------------------------------------------------------------- #
def init_params(key, c1, c2):
    c2q = c2 // 4
    ks = jax.random.split(key, 15)
    eps = 1e-5

    def bn_fold(kg, kb, km, kv, c):
        gamma = 1.0 + 0.1 * jax.random.normal(kg, (c,), jnp.float32)
        beta = 0.1 * jax.random.normal(kb, (c,), jnp.float32)
        mean = 0.1 * jax.random.normal(km, (c,), jnp.float32)
        var = 1.0 + 0.5 * jax.random.uniform(kv, (c,), jnp.float32)
        scale = gamma / jnp.sqrt(var + eps)
        bias = beta - mean * scale
        return scale[None, :], bias[None, :]

    wcw = 0.1 * jax.random.normal(ks[0], (3, c1, c2q), jnp.float32)     # (kw, Cin, Cout)
    wch = 0.1 * jax.random.normal(ks[1], (3, c1, c2q), jnp.float32)     # (kh, Cin, Cout)
    wcat = 0.1 * jax.random.normal(ks[2], (2, 2, c2, c2), jnp.float32)  # HWIO
    scw, bcw = bn_fold(ks[3], ks[4], ks[5], ks[6], c2q)
    sch, bch = bn_fold(ks[7], ks[8], ks[9], ks[10], c2q)
    scat, bcat = bn_fold(ks[11], ks[12], ks[13], ks[14], c2)
    return dict(wcw=wcw, wch=wch, wcat=wcat,
                scw=scw, bcw=bcw, sch=sch, bch=bch, scat=scat, bcat=bcat)


# ----------------------------------------------------------------------------- #
# Pure-JAX reference (lax.conv) for correctness check
# ----------------------------------------------------------------------------- #
def spconv_reference(x_nchw, params):
    x = jnp.transpose(x_nchw, (0, 2, 3, 1)).astype(jnp.float32)
    dn = ("NHWC", "HWIO", "NHWC")

    def conv_bn_silu(xp, w_hwio, scale, bias):
        y = lax.conv_general_dilated(xp, w_hwio, (1, 1), "VALID", dimension_numbers=dn)
        y = y * scale[None, None] + bias[None, None]
        return y * jax.nn.sigmoid(y)

    wcw_hwio = params["wcw"][None]                      # (1,3,C1,Cq)
    wch_hwio = params["wch"][:, None]                   # (3,1,C1,Cq)
    xp0 = jnp.pad(x, ((0, 0), (1, 0), (3, 0), (0, 0)))
    xp1 = jnp.pad(x, ((0, 0), (0, 1), (0, 3), (0, 0)))
    xp2 = jnp.pad(x, ((0, 0), (3, 0), (0, 1), (0, 0)))
    xp3 = jnp.pad(x, ((0, 0), (0, 3), (1, 0), (0, 0)))
    yw0 = conv_bn_silu(xp0, wcw_hwio, params["scw"], params["bcw"])
    yw1 = conv_bn_silu(xp1, wcw_hwio, params["scw"], params["bcw"])
    yh0 = conv_bn_silu(xp2, wch_hwio, params["sch"], params["bch"])
    yh1 = conv_bn_silu(xp3, wch_hwio, params["sch"], params["bch"])
    x1 = jnp.roll(yw0, 1, axis=1)
    x2 = jnp.roll(yw1, -1, axis=1)
    x3 = jnp.roll(yh0, 1, axis=2)
    x4 = jnp.roll(yh1, -1, axis=2)
    cat = jnp.concatenate([x1, x2, x3, x4], axis=-1)
    y = conv_bn_silu(cat, params["wcat"], params["scat"], params["bcat"])
    return jnp.transpose(y, (0, 3, 1, 2))


# ----------------------------------------------------------------------------- #
if __name__ == "__main__":
    key = jax.random.PRNGKey(0)
    kx, kp = jax.random.split(key)

    N, C1, H, W = 2, 4, 16, 16
    C2 = 8                                # SPConv(c1=4, c2=8), k=3, s=1
    x = jax.random.normal(kx, (N, C1, H, W), jnp.float32)
    params = init_params(kp, C1, C2)

    out = jax.block_until_ready(spconv_forward(x, params))
    ref = jax.block_until_ready(spconv_reference(x, params))

    assert out.shape == (N, C2, H, W), out.shape
    np.testing.assert_allclose(np.asarray(out), np.asarray(ref), rtol=1e-4, atol=1e-4)
    print("KERNEL_OK")
</pallas_src>

<mosaic_0001>
module attributes {stable_mosaic.version = 11 : i64} {
  func.func @kernel(%arg0: i32, %arg1: memref<1x4x256xf32, #tpu.memory_space<vmem>>, %arg2: memref<12x4xf32, #tpu.memory_space<vmem>>, %arg3: memref<32x8xf32, #tpu.memory_space<vmem>>, %arg4: memref<12x1xf32, #tpu.memory_space<vmem>>, %arg5: memref<2x409xf32, #tpu.memory_space<vmem>>, %arg6: memref<1x8x384xf32, #tpu.memory_space<vmem>>, %arg7: memref<4x552xf32, #tpu.memory_space<vmem>>) attributes {dimension_semantics = [#tpu.dimension_semantics<parallel>], iteration_bounds = array<i64: 2>, scalar_prefetch = 0 : i64, scratch_operands = 1 : i64, tpu.core_type = #tpu.core_type<tc>, window_params = [{transform_indices = @transform_0, window_bounds = array<i64: 1, 4, 256>}, {pipeline_mode = #tpu.pipeline_mode<synchronous>, transform_indices = @transform_1, window_bounds = array<i64: 12, 4>}, {pipeline_mode = #tpu.pipeline_mode<synchronous>, transform_indices = @transform_2, window_bounds = array<i64: 32, 8>}, {pipeline_mode = #tpu.pipeline_mode<synchronous>, transform_indices = @transform_3, window_bounds = array<i64: 12, 1>}, {pipeline_mode = #tpu.pipeline_mode<synchronous>, transform_indices = @transform_4, window_bounds = array<i64: 2, 409>}, {transform_indices = @transform_5, window_bounds = array<i64: 1, 8, 384>}]} {
    %cst = arith.constant 0.000000e+00 : f32
    %0 = vector.broadcast %cst : f32 to vector<4x552xf32>
    %c0 = arith.constant 0 : index
    %c0_0 = arith.constant 0 : index
    %1 = vector.load %arg7[%c0, %c0_0] : memref<4x552xf32, #tpu.memory_space<vmem>>, vector<4x552xf32>
    tpu.vector_store %arg7[%c0, %c0_0], %0 {strides = array<i32>} : memref<4x552xf32, #tpu.memory_space<vmem>>, vector<4x552xf32>,
    %c0_1 = arith.constant 0 : index
    %c0_2 = arith.constant 0 : index
    %2 = vector.load %arg2[%c0_1, %c0_2] : memref<12x4xf32, #tpu.memory_space<vmem>>, vector<12x4xf32>
    %c0_3 = arith.constant 0 : index
    %c0_4 = arith.constant 0 : index
    %3 = vector.load %arg3[%c0_3, %c0_4] : memref<32x8xf32, #tpu.memory_space<vmem>>, vector<32x8xf32>
    %c0_5 = arith.constant 0 : index
    %c0_6 = arith.constant 0 : index
    %4 = vector.load %arg4[%c0_5, %c0_6] : memref<12x1xf32, #tpu.memory_space<vmem>>, vector<2x1xf32>
    %c2 = arith.constant 2 : index
    %c0_7 = arith.constant 0 : index
    %5 = vector.load %arg4[%c2, %c0_7] : memref<12x1xf32, #tpu.memory_space<vmem>>, vector<2x1xf32>
    %c4 = arith.constant 4 : index
    %c0_8 = arith.constant 0 : index
    %6 = vector.load %arg4[%c4, %c0_8] : memref<12x1xf32, #tpu.memory_space<vmem>>, vector<8x1xf32>
    %c0_9 = arith.constant 0 : index
    %c0_10 = arith.constant 0 : index
    %7 = vector.load %arg5[%c0_9, %c0_10] : memref<2x409xf32, #tpu.memory_space<vmem>>, vector<1x409xf32>
    %cst_11 = arith.constant 5.000000e-01 : f32
    %8 = vector.broadcast %cst_11 : f32 to vector<1x409xf32>
    %9 = arith.cmpf ogt, %7, %8 : vector<1x409xf32>
    %c1 = arith.constant 1 : index
    %c0_12 = arith.constant 0 : index
    %10 = vector.load %arg5[%c1, %c0_12] : memref<2x409xf32, #tpu.memory_space<vmem>>, vector<1x409xf32>
    %cst_13 = arith.constant 5.000000e-01 : f32
    %11 = vector.broadcast %cst_13 : f32 to vector<1x409xf32>
    %12 = arith.cmpf ogt, %10, %11 : vector<1x409xf32>
    %c0_14 = arith.constant 0 : index
    %c0_15 = arith.constant 0 : index
    %c0_16 = arith.constant 0 : index
    %13 = vector.load %arg1[%c0_14, %c0_15, %c0_16] : memref<1x4x256xf32, #tpu.memory_space<vmem>>, vector<1x4x16xf32>
    %14 = vector.shape_cast %13 : vector<1x4x16xf32> to vector<4x16xf32>
    %c0_17 = arith.constant 0 : index
    %c75 = arith.constant 75 : index
    %15 = vector.load %arg7[%c0_17, %c75] : memref<4x552xf32, #tpu.memory_space<vmem>>, vector<4x16xf32>
    tpu.vector_store %arg7[%c0_17, %c75], %14 {strides = array<i32>} : memref<4x552xf32, #tpu.memory_space<vmem>>, vector<4x16xf32>,
    %c0_18 = arith.constant 0 : index
    %c0_19 = arith.constant 0 : index
    %c16 = arith.constant 16 : index
    %16 = vector.load %arg1[%c0_18, %c0_19, %c16] : memref<1x4x256xf32, #tpu.memory_space<vmem>>, vector<1x4x16xf32>
    %17 = vector.shape_cast %16 : vector<1x4x16xf32> to vector<4x16xf32>
    %c0_20 = arith.constant 0 : index
    %c99 = arith.constant 99 : index
    %18 = vector.load %arg7[%c0_20, %c99] : memref<4x552xf32, #tpu.memory_space<vmem>>, vector<4x16xf32>
    tpu.vector_store %arg7[%c0_20, %c99], %17 {strides = array<i32>} : memref<4x552xf32, #tpu.memory_space<vmem>>, vector<4x16xf32>,
    %c0_21 = arith.constant 0 : index
    %c0_22 = arith.constant 0 : index
    %c32 = arith.constant 32 : index
    %19 = vector.load %arg1[%c0_21, %c0_22, %c32] : memref<1x4x256xf32, #tpu.memory_space<vmem>>, vector<1x4x16xf32>
    %20 = vector.shape_cast %19 : vector<1x4x16xf32> to vector<4x16xf32>
    %c0_23 = arith.constant 0 : index
    %c123 = arith.constant 123 : index
    %21 = vector.load %arg7[%c0_23, %c123] : memref<4x552xf32, #tpu.memory_space<vmem>>, vector<4x16xf32>
    tpu.vector_store %arg7[%c0_23, %c123], %20 {strides = array<i32>} : memref<4x552xf32, #tpu.memory_space<vmem>>, vector<4x16xf32>,
    %c0_24 = arith.constant 0 : index
    %c0_25 = arith.constant 0 : index
    %c48 = arith.constant 48 : index
    %22 = vector.load %arg1[%c0_24, %c0_25, %c48] : memref<1x4x256xf32, #tpu.memory_space<vmem>>, vector<1x4x16xf32>
    %23 = vector.shape_cast %22 : vector<1x4x16xf32> to vector<4x16xf32>
    %c0_26 = arith.constant 0 : index
    %c147 = arith.constant 147 : index
    %24 = vector.load %arg7[%c0_26, %c147] : memref<4x552xf32, #tpu.memory_space<vmem>>, vector<4x16xf32>
    tpu.vector_store %arg7[%c0_26, %c147], %23 {strides = array<i32>} : memref<4x552xf32, #tpu.memory_space<vmem>>, vector<4x16xf32>,
    %c0_27 = arith.constant 0 : index
    %c0_28 = arith.constant 0 : index
    %c64 = arith.constant 64 : index
    %25 = vector.load %arg1[%c0_27, %c0_28, %c64] : memref<1x4x256xf32, #tpu.memory_space<vmem>>, vector<1x4x16xf32>
    %26 = vector.shape_cast %25 : vector<1x4x16xf32> to vector<4x16xf32>
    %c0_29 = arith.constant 0 : index
    %c171 = arith.constant 171 : index
    %27 = vector.load %arg7[%c0_29, %c171] : memref<4x552xf32, #tpu.memory_space<vmem>>, vector<4x16xf32>
    tpu.vector_store %arg7[%c0_29, %c171], %26 {strides = array<i32>} : memref<4x552xf32, #tpu.memory_space<vmem>>, vector<4x16xf32>,
    %c0_30 = arith.constant 0 : index
    %c0_31 = arith.constant 0 : index
    %c80 = arith.constant 80 : index
    %28 = vector.load %arg1[%c0_30, %c0_31, %c80] : memref<1x4x256xf32, #tpu.memory_space<vmem>>, vector<1x4x16xf32>
    %29 = vector.shape_cast %28 : vector<1x4x16xf32> to vector<4x16xf32>
    %c0_32 = arith.constant 0 : index
    %c195 = arith.constant 195 : index
    %30 = vector.load %arg7[%c0_32, %c195] : memref<4x552xf32, #tpu.memory_space<vmem>>, vector<4x16xf32>
    tpu.vector_store %arg7[%c0_32, %c195], %29 {strides = array<i32>} : memref<4x552xf32, #tpu.memory_space<vmem>>, vector<4x16xf32>,
    %c0_33 = arith.constant 0 : index
    %c0_34 = arith.constant 0 : index
    %c96 = arith.constant 96 : index
    %31 = vector.load %arg1[%c0_33, %c0_34, %c96] : memref<1x4x256xf32, #tpu.memory_space<vmem>>, vector<1x4x16xf32>
    %32 = vector.shape_cast %31 : vector<1x4x16xf32> to vector<4x16xf32>
    %c0_35 = arith.constant 0 : index
    %c219 = arith.constant 219 : index
    %33 = vector.load %arg7[%c0_35, %c219] : memref<4x552xf32, #tpu.memory_space<vmem>>, vector<4x16xf32>
    tpu.vector_store %arg7[%c0_35, %c219], %32 {strides = array<i32>} : memref<4x552xf32, #tpu.memory_space<vmem>>, vector<4x16xf32>,
    %c0_36 = arith.constant 0 : index
    %c0_37 = arith.constant 0 : index
    %c112 = arith.constant 112 : index
    %34 = vector.load %arg1[%c0_36, %c0_37, %c112] : memref<1x4x256xf32, #tpu.memory_space<vmem>>, vector<1x4x16xf32>
    %35 = vector.shape_cast %34 : vector<1x4x16xf32> to vector<4x16xf32>
    %c0_38 = arith.constant 0 : index
    %c243 = arith.constant 243 : index
    %36 = vector.load %arg7[%c0_38, %c243] : memref<4x552xf32, #tpu.memory_space<vmem>>, vector<4x16xf32>
    tpu.vector_store %arg7[%c0_38, %c243], %35 {strides = array<i32>} : memref<4x552xf32, #tpu.memory_space<vmem>>, vector<4x16xf32>,
    %c0_39 = arith.constant 0 : index
    %c0_40 = arith.constant 0 : index
    %c128 = arith.constant 128 : index
    %37 = vector.load %arg1[%c0_39, %c0_40, %c128] : memref<1x4x256xf32, #tpu.memory_space<vmem>>, vector<1x4x16xf32>
    %38 = vector.shape_cast %37 : vector<1x4x16xf32> to vector<4x16xf32>
    %c0_41 = arith.constant 0 : index
    %c267 = arith.constant 267 : index
    %39 = vector.load %arg7[%c0_41, %c267] : memref<4x552xf32, #tpu.memory_space<vmem>>, vector<4x16xf32>
    tpu.vector_store %arg7[%c0_41, %c267], %38 {strides = array<i32>} : memref<4x552xf32, #tpu.memory_space<vmem>>, vector<4x16xf32>,
    %c0_42 = arith.constant 0 : index
    %c0_43 = arith.constant 0 : index
    %c144 = arith.constant 144 : index
    %40 = vector.load %arg1[%c0_42, %c0_43, %c144] : memref<1x4x256xf32, #tpu.memory_space<vmem>>, vector<1x4x16xf32>
    %41 = vector.shape_cast %40 : vector<1x4x16xf32> to vector<4x16xf32>
    %c0_44 = arith.constant 0 : index
    %c291 = arith.constant 291 : index
    %42 = vector.load %arg7[%c0_44, %c291] : memref<4x552xf32, #tpu.memory_space<vmem>>, vector<4x16xf32>
    tpu.vector_store %arg7[%c0_44, %c291], %41 {strides = array<i32>} : memref<4x552xf32, #tpu.memory_space<vmem>>, vector<4x16xf32>,
    %c0_45 = arith.constant 0 : index
    %c0_46 = arith.constant 0 : index
    %c160 = arith.constant 160 : index
    %43 = vector.load %arg1[%c0_45, %c0_46, %c160] : memref<1x4x256xf32, #tpu.memory_space<vmem>>, vector<1x4x16xf32>
    %44 = vector.shape_cast %43 : vector<1x4x16xf32> to vector<4x16xf32>
    %c0_47 = arith.constant 0 : index
    %c315 = arith.constant 315 : index
    %45 = vector.load %arg7[%c0_47, %c315] : memref<4x552xf32, #tpu.memory_space<vmem>>, vector<4x16xf32>
    tpu.vector_store %arg7[%c0_47, %c315], %44 {strides = array<i32>} : memref<4x552xf32, #tpu.memory_space<vmem>>, vector<4x16xf32>,
    %c0_48 = arith.constant 0 : index
    %c0_49 = arith.constant 0 : index
    %c176 = arith.constant 176 : index
    %46 = vector.load %arg1[%c0_48, %c0_49, %c176] : memref<1x4x256xf32, #tpu.memory_space<vmem>>, vector<1x4x16xf32>
    %47 = vector.shape_cast %46 : vector<1x4x16xf32> to vector<4x16xf32>
    %c0_50 = arith.constant 0 : index
    %c339 = arith.constant 339 : index
    %48 = vector.load %arg7[%c0_50, %c339] : memref<4x552xf32, #tpu.memory_space<vmem>>, vector<4x16xf32>
    tpu.vector_store %arg7[%c0_50, %c339], %47 {strides = array<i32>} : memref<4x552xf32, #tpu.memory_space<vmem>>, vector<4x16xf32>,
    %c0_51 = arith.constant 0 : index
    %c0_52 = arith.constant 0 : index
    %c192 = arith.constant 192 : index
    %49 = vector.load %arg1[%c0_51, %c0_52, %c192] : memref<1x4x256xf32, #tpu.memory_space<vmem>>, vector<1x4x16xf32>
    %50 = vector.shape_cast %49 : vector<1x4x16xf32> to vector<4x16xf32>
    %c0_53 = arith.constant 0 : index
    %c363 = arith.constant 363 : index
    %51 = vector.load %arg7[%c0_53, %c363] : memref<4x552xf32, #tpu.memory_space<vmem>>, vector<4x16xf32>
    tpu.vector_store %arg7[%c0_53, %c363], %50 {strides = array<i32>} : memref<4x552xf32, #tpu.memory_space<vmem>>, vector<4x16xf32>,
    %c0_54 = arith.constant 0 : index
    %c0_55 = arith.constant 0 : index
    %c208 = arith.constant 208 : index
    %52 = vector.load %arg1[%c0_54, %c0_55, %c208] : memref<1x4x256xf32, #tpu.memory_space<vmem>>, vector<1x4x16xf32>
    %53 = vector.shape_cast %52 : vector<1x4x16xf32> to vector<4x16xf32>
    %c0_56 = arith.constant 0 : index
    %c387 = arith.constant 387 : index
    %54 = vector.load %arg7[%c0_56, %c387] : memref<4x552xf32, #tpu.memory_space<vmem>>, vector<4x16xf32>
    tpu.vector_store %arg7[%c0_56, %c387], %53 {strides = array<i32>} : memref<4x552xf32, #tpu.memory_space<vmem>>, vector<4x16xf32>,
    %c0_57 = arith.constant 0 : index
    %c0_58 = arith.constant 0 : index
    %c224 = arith.constant 224 : index
    %55 = vector.load %arg1[%c0_57, %c0_58, %c224] : memref<1x4x256xf32, #tpu.memory_space<vmem>>, vector<1x4x16xf32>
    %56 = vector.shape_cast %55 : vector<1x4x16xf32> to vector<4x16xf32>
    %c0_59 = arith.constant 0 : index
    %c411 = arith.constant 411 : index
    %57 = vector.load %arg7[%c0_59, %c411] : memref<4x552xf32, #tpu.memory_space<vmem>>, vector<4x16xf32>
    tpu.vector_store %arg7[%c0_59, %c411], %56 {strides = array<i32>} : memref<4x552xf32, #tpu.memory_space<vmem>>, vector<4x16xf32>,
    %c0_60 = arith.constant 0 : index
    %c0_61 = arith.constant 0 : index
    %c240 = arith.constant 240 : index
    %58 = vector.load %arg1[%c0_60, %c0_61, %c240] : memref<1x4x256xf32, #tpu.memory_space<vmem>>, vector<1x4x16xf32>
    %59 = vector.shape_cast %58 : vector<1x4x16xf32> to vector<4x16xf32>
    %c0_62 = arith.constant 0 : index
    %c435 = arith.constant 435 : index
    %60 = vector.load %arg7[%c0_62, %c435] : memref<4x552xf32, #tpu.memory_space<vmem>>, vector<4x16xf32>
    tpu.vector_store %arg7[%c0_62, %c435], %59 {strides = array<i32>} : memref<4x552xf32, #tpu.memory_space<vmem>>, vector<4x16xf32>,
    %c0_63 = arith.constant 0 : index
    %c0_64 = arith.constant 0 : index
    %61 = vector.load %arg7[%c0_63, %c0_64] : memref<4x552xf32, #tpu.memory_space<vmem>>, vector<4x552xf32>
    %cst_65 = arith.constant dense<0.000000e+00> : vector<12x552xf32>
    %62 = tpu.matmul %2, %61, %cst_65 {dimension_numbers = #tpu.dot_dimension_numbers<[1], [0], [0], [1], [0, 0, 1, 1], [], []>} : vector<12x4xf32>, vector<4x552xf32>, vector<12x552xf32> -> vector<12x552xf32>
    %63 = vector.extract_strided_slice %62 {offsets = [0, 0], sizes = [2, 528], strides = [1, 1]} : vector<12x552xf32> to vector<2x528xf32>
    %64 = vector.extract_strided_slice %62 {offsets = [2, 1], sizes = [2, 528], strides = [1, 1]} : vector<12x552xf32> to vector<2x528xf32>
    %65 = arith.addf %63, %64 : vector<2x528xf32>
    %66 = vector.extract_strided_slice %62 {offsets = [4, 2], sizes = [2, 528], strides = [1, 1]} : vector<12x552xf32> to vector<2x528xf32>
    %67 = arith.addf %65, %66 : vector<2x528xf32>
    %68 = vector.broadcast %4 : vector<2x1xf32> to vector<2x528xf32>
    %69 = arith.addf %67, %68 : vector<2x528xf32>
    %70 = arith.negf %69 : vector<2x528xf32>
    %71 = math.exp %70 : vector<2x528xf32>
    %cst_66 = arith.constant 1.000000e+00 : f32
    %72 = vector.broadcast %cst_66 : f32 to vector<2x528xf32>
    %73 = arith.addf %72, %71 : vector<2x528xf32>
    %74 = arith.divf %72, %73 : vector<2x528xf32>
    %75 = arith.mulf %69, %74 : vector<2x528xf32>
    %76 = vector.extract_strided_slice %62 {offsets = [6, 0], sizes = [2, 504], strides = [1, 1]} : vector<12x552xf32> to vector<2x504xf32>
    %77 = vector.extract_strided_slice %62 {offsets = [8, 24], sizes = [2, 504], strides = [1, 1]} : vector<12x552xf32> to vector<2x504xf32>
    %78 = arith.addf %76, %77 : vector<2x504xf32>
    %79 = vector.extract_strided_slice %62 {offsets = [10, 48], sizes = [2, 504], strides = [1, 1]} : vector<12x552xf32> to vector<2x504xf32>
    %80 = arith.addf %78, %79 : vector<2x504xf32>
    %81 = vector.broadcast %5 : vector<2x1xf32> to vector<2x504xf32>
    %82 = arith.addf %80, %81 : vector<2x504xf32>
    %83 = arith.negf %82 : vector<2x504xf32>
    %84 = math.exp %83 : vector<2x504xf32>
    %cst_67 = arith.constant 1.000000e+00 : f32
    %85 = vector.broadcast %cst_67 : f32 to vector<2x504xf32>
    %86 = arith.addf %85, %84 : vector<2x504xf32>
    %87 = arith.divf %85, %86 : vector<2x504xf32>
    %88 = arith.mulf %82, %87 : vector<2x504xf32>
    %89 = vector.extract_strided_slice %75 {offsets = [0, 432], sizes = [2, 24], strides = [1, 1]} : vector<2x528xf32> to vector<2x24xf32>
    %90 = vector.extract_strided_slice %75 {offsets = [0, 48], sizes = [2, 385], strides = [1, 1]} : vector<2x528xf32> to vector<2x385xf32>
    %91 = tpu.concatenate %89, %90 in 1 : vector<2x24xf32>, vector<2x385xf32> -> vector<2x409xf32>
    %92 = vector.extract_strided_slice %75 {offsets = [0, 99], sizes = [2, 384], strides = [1, 1]} : vector<2x528xf32> to vector<2x384xf32>
    %93 = vector.extract_strided_slice %75 {offsets = [0, 75], sizes = [2, 25], strides = [1, 1]} : vector<2x528xf32> to vector<2x25xf32>
    %94 = tpu.concatenate %92, %93 in 1 : vector<2x384xf32>, vector<2x25xf32> -> vector<2x409xf32>
    %95 = vector.extract_strided_slice %88 {offsets = [0, 19], sizes = [2, 409], strides = [1, 1]} : vector<2x504xf32> to vector<2x409xf32>
    %96 = vector.extract_strided_slice %88 {offsets = [0, 2], sizes = [2, 409], strides = [1, 1]} : vector<2x504xf32> to vector<2x409xf32>
    %97 = vector.shape_cast %9 : vector<1x409xi1> to vector<1x409xi1>
    %98 = vector.broadcast %97 : vector<1x409xi1> to vector<2x409xi1>
    %99 = arith.select %98, %95, %96 : vector<2x409xi1>, vector<2x409xf32>
    %100 = vector.extract_strided_slice %88 {offsets = [0, 58], sizes = [2, 409], strides = [1, 1]} : vector<2x504xf32> to vector<2x409xf32>
    %101 = vector.extract_strided_slice %88 {offsets = [0, 75], sizes = [2, 409], strides = [1, 1]} : vector<2x504xf32> to vector<2x409xf32>
    %102 = vector.shape_cast %12 : vector<1x409xi1> to vector<1x409xi1>
    %103 = vector.broadcast %102 : vector<1x409xi1> to vector<2x409xi1>
    %104 = arith.select %103, %100, %101 : vector<2x409xi1>, vector<2x409xf32>
    %105 = tpu.concatenate %91, %94, %99, %104 in 0 : vector<2x409xf32>, vector<2x409xf32>, vector<2x409xf32>, vector<2x409xf32> -> vector<8x409xf32>
    %cst_68 = arith.constant dense<0.000000e+00> : vector<32x409xf32>
    %106 = tpu.matmul %3, %105, %cst_68 {dimension_numbers = #tpu.dot_dimension_numbers<[1], [0], [0], [1], [0, 0, 1, 1], [], []>} : vector<32x8xf32>, vector<8x409xf32>, vector<32x409xf32> -> vector<32x409xf32>
    %107 = vector.extract_strided_slice %106 {offsets = [0, 0], sizes = [8, 384], strides = [1, 1]} : vector<32x409xf32> to vector<8x384xf32>
    %108 = vector.extract_strided_slice %106 {offsets = [8, 1], sizes = [8, 384], strides = [1, 1]} : vector<32x409xf32> to vector<8x384xf32>
    %109 = arith.addf %107, %108 : vector<8x384xf32>
    %110 = vector.extract_strided_slice %106 {offsets = [16, 24], sizes = [8, 384], strides = [1, 1]} : vector<32x409xf32> to vector<8x384xf32>
    %111 = arith.addf %109, %110 : vector<8x384xf32>
    %112 = vector.extract_strided_slice %106 {offsets = [24, 25], sizes = [8, 384], strides = [1, 1]} : vector<32x409xf32> to vector<8x384xf32>
    %113 = arith.addf %111, %112 : vector<8x384xf32>
    %114 = vector.broadcast %6 : vector<8x1xf32> to vector<8x384xf32>
    %115 = arith.addf %113, %114 : vector<8x384xf32>
    %116 = arith.negf %115 : vector<8x384xf32>
    %117 = math.exp %116 : vector<8x384xf32>
    %cst_69 = arith.constant 1.000000e+00 : f32
    %118 = vector.broadcast %cst_69 : f32 to vector<8x384xf32>
    %119 = arith.addf %118, %117 : vector<8x384xf32>
    %120 = arith.divf %118, %119 : vector<8x384xf32>
    %121 = arith.mulf %115, %120 : vector<8x384xf32>
    %c0_70 = arith.constant 0 : index
    %c0_71 = arith.constant 0 : index
    %c0_72 = arith.constant 0 : index
    %122 = vector.load %arg6[%c0_70, %c0_71, %c0_72] : memref<1x8x384xf32, #tpu.memory_space<vmem>>, vector<1x8x384xf32>
    %123 = vector.shape_cast %122 : vector<1x8x384xf32> to vector<8x384xf32>
    %124 = vector.shape_cast %121 : vector<8x384xf32> to vector<1x8x384xf32>
    tpu.vector_store %arg6[%c0_70, %c0_71, %c0_72], %124 {strides = array<i32>} : memref<1x8x384xf32, #tpu.memory_space<vmem>>, vector<1x8x384xf32>,
    return
  }
  func.func @transform_0(%arg0: i32) -> (i32, i32, i32) {
    %c0_i32 = arith.constant 0 : i32
    %c0_i32_0 = arith.constant 0 : i32
    %c0_i32_1 = arith.constant 0 : i32
    return %arg0, %c0_i32, %c0_i32_0 : i32, i32, i32
  }
  func.func @transform_1(%arg0: i32) -> (i32, i32) {
    %c0_i32 = arith.constant 0 : i32
    %c0_i32_0 = arith.constant 0 : i32
    %c0_i32_1 = arith.constant 0 : i32
    return %c0_i32, %c0_i32_0 : i32, i32
  }
  func.func @transform_2(%arg0: i32) -> (i32, i32) {
    %c0_i32 = arith.constant 0 : i32
    %c0_i32_0 = arith.constant 0 : i32
    %c0_i32_1 = arith.constant 0 : i32
    return %c0_i32, %c0_i32_0 : i32, i32
  }
  func.func @transform_3(%arg0: i32) -> (i32, i32) {
    %c0_i32 = arith.constant 0 : i32
    %c0_i32_0 = arith.constant 0 : i32
    %c0_i32_1 = arith.constant 0 : i32
    return %c0_i32, %c0_i32_0 : i32, i32
  }
  func.func @transform_4(%arg0: i32) -> (i32, i32) {
    %c0_i32 = arith.constant 0 : i32
    %c0_i32_0 = arith.constant 0 : i32
    %c0_i32_1 = arith.constant 0 : i32
    return %c0_i32, %c0_i32_0 : i32, i32
  }
  func.func @transform_5(%arg0: i32) -> (i32, i32, i32) {
    %c0_i32 = arith.constant 0 : i32
    %c0_i32_0 = arith.constant 0 : i32
    %c0_i32_1 = arith.constant 0 : i32
    return %arg0, %c0_i32, %c0_i32_0 : i32, i32, i32
  }
}

</mosaic_0001>

<bundles_post_ra>
// kernel: tpu_custom_call.1
= control target key start
LH: loop header
LB: loop body
LE: loop exit
PB: predicated region body
PF: predicated region fallthrough
CT: control target
= control target key end

     0   :  { %10 = vsyncpa [#allocation4], 0  ;;  %s2036_s0 = inlined_call_operand.vmem [shape: f32[2,4,256], index: 0, kind: input, shape index: {}]   ;;  %s2037_s1 = inlined_call_operand.vmem [shape: f32[12,4], index: 1, kind: input, shape index: {}]   ;;  %s2038_s2 = inlined_call_operand.vmem [shape: f32[32,8], index: 2, kind: input, shape index: {}]   ;;  %s2039_s3 = inlined_call_operand.vmem [shape: f32[12,1], index: 3, kind: input, shape index: {}]   ;;  %s2040_s4 = inlined_call_operand.vmem [shape: f32[2,409], index: 4, kind: input, shape index: {}]   ;;  %s2041_s5 = inlined_call_operand.hbm [shape: f32[2,8,384], index: 5, kind: output, shape index: {}]  }
   0x1   :  { %12 = vsyncpa [#allocation4 + $0x1], 0  ;;  %s1665_s18 = smov 0   ;;  %s1667_s19 = smov 0  }
   0x2   :  { %s1669_s20 = smov 0   ;;  %s1671_s21 = smov 0  }
   0x3 LB: > { %s1686_s22 = sadd.s32 4294967295, %s1605_s21   ;;  %s1380_s23 = sadd.s32 4294967294, %s1605_s21   ;;  %s1605_s21 = sphi %s1671_s21, %s2060_s21   ;;  %s1601_s20 = sphi %s1669_s20, %s2059_s20   ;;  %s1597_s19 = sphi %s1667_s19, %s2058_s19   ;;  %s1593_s18 = sphi %s1665_s18, %s2057_s18  }
   0x4   : > { %s1690_s24 = sadd.s32 1, %s1605_s21   ;;  %s135_s25 = sadd.s32 1, %s1601_s20 }
   0x5   : > { %s132_s26 = ssub.s32 %s1605_s21, %s1690_s24  ;;  %p145_p0 = scmp.ne.s32.totalorder %s1601_s20, %s1597_s19 }
   0x6   : > { %p133_p1 = scmp.eq.s32.totalorder %s132_s26, 0  ;;  %p146_p2 = scmp.eq.s32.totalorder %s1686_s22, 1 }
   0x7   : > { %p151_p3 = scmp.ne.s32.totalorder %s1597_s19, %s1593_s18  ;;  %p152_p4 = scmp.eq.s32.totalorder %s1380_s23, 1 }
   0x8   : > { %s1701_s27 = scalar_select %p133_p1, %s1601_s20, %s135_s25  }
   0x9   : > { %p1703_p5 = por %p146_p2, %p145_p0  ;;  %p1707_p6 = por %p152_p4, %p151_p3 }
   0xa   : > { %p1383_p7 = scmp.ge.s32.totalorder %s1605_s21, 1  ;;  %p190_p8 = scmp.lt.s32.totalorder %s1605_s21, 3 }
   0xc   : > { %p191_p9 = pnand %p1383_p7, %p190_p8 }
   0xd   : > { %p218_p10 = scmp.lt.s32.totalorder (!%p191_p9), %s1686_s22, 1  ;;  %s1608_s10 = smov (!%p191_p9), 91  }
   0xe   : > { %194 = sbr.rel (%p191_p9) target bundleno = 1116 (0x45c), region = 40  ;;  %s1609_s11 = smov (!%p191_p9), 83  }
   0xf   : > { %s1610_s12 = smov (!%p191_p9), 99   ;;  %s1611_s13 = smov (!%p191_p9), 75  }
  0x10   : > { %s1612_s14 = smov (!%p191_p9), 3   ;;  %s1613_s15 = smov (!%p191_p9), 107  }
  0x11   : > { %s1614_s16 = smov (!%p191_p9), 123   ;;  %s1615_s17 = smov (!%p191_p9), 115  }
  0x12   : > { %s1616_s23 = smov (!%p191_p9), 19   ;;  %s1617_s25 = smov (!%p191_p9), 11  }
  0x13   : > { %v1607_v0 = vmov 0.0   ;;  %s219_s30 = scalar_select %p218_p10, %s1686_s22, 1  ;;  %vm225_vm0 = vcmask 322560   ;;  %v234_v17 = vld [vmem:[%s2039_s3 + $0x2] sm:$0x3]  ;;  %v1624_v18 = vmov 0  }
  0x14   : > { %223 = vst [vmem:[#allocation2] sm:$0xff] %v1607_v0  ;;  %224 = vst [vmem:[#allocation2 + $0x8] sm:$0xff] %v1607_v0  ;;  %453 = vmatprep.mubr.f32.mxu0 %v1607_v0  ;;  %530 = vmatprep.mubr.f32.mxu1 %v1607_v0  ;;  %s1618_s26 = smov 51   ;;  %s1621_s7 = smov 35   ;;  %v233_v19 = vld [vmem:[%s2039_s3] sm:$0x3] }
  0x15   : > { %s1420_s6 = sshll.u32 %s219_s30, 3  ;;  %s1619_s30 = smov 27   ;;  %226 = vst.msk [vmem:[#allocation2 + $0x10] sm:$0xf] %vm225_vm0, %v1607_v0  ;;  %1497 = vset.pattern.permute.xlu0 %v1624_v18  ;;  %1498 = vset.pattern.permute.xlu1 %v1624_v18  ;;  %vm263_vm1 = vcmask 1044440   ;;  %vm264_vm2 = vcmask 89092  }
  0x16   : > { %s1722_s9 = scalar_lea.vmem %s2036_s0, %s1420_s6  ;;  %s1620_s6 = smov 59   ;;  %vm246_vm3 = vcmask 740952   ;;  %vm260_vm4 = vcmask 744448   ;;  %vm253_vm5 = vcmask 937752   ;;  %vm265_vm6 = vmor %vm264_vm2, %vm263_vm1  ;;  %vm272_vm7 = vcmask 281752   ;;  %v227_v40 = vld [vmem:[%s2037_s1] sm:$0xff] }
  0x17   : > { %v255_v1 = vld [vmem:[%s1722_s9] sm:$0xf]  ;;  %v314_v9 = vld [vmem:[%s1722_s9 + $0x4] sm:$0xf]  ;;  %s1622_s8 = smov 67   ;;  %vm279_vm8 = vcmask 478552  }
  0x18   : > { %v248_v2 = vld [vmem:[%s1722_s9] sm:$0xf]  ;;  %257 = vrot.lane.b32.xlu0 %v255_v1, %s1608_s10  ;;  %v307_v10 = vld [vmem:[%s1722_s9 + $0x4] sm:$0xf]  ;;  %s1623_s10 = smov 43   ;;  %vm303_vm9 = vcmask 1044376  }
  0x19   : > { %250 = vrot.lane.b32.xlu1 %v248_v2, %s1609_s11  ;;  %v267_v3 = vld [vmem:[%s1722_s9] sm:$0xf]  ;;  %v342_v11 = vld [vmem:[%s1722_s9 + $0x4] sm:$0xf]  ;;  %vm304_vm10 = vcmask 23556   ;;  %vm286_vm11 = vcmask 675352  }
  0x1a   : > { %v241_v4 = vld [vmem:[%s1722_s9] sm:$0xf]  ;;  %v321_v12 = vld [vmem:[%s1722_s9 + $0x4] sm:$0xf]  ;;  %vm300_vm12 = vcmask 23552   ;;  %vm293_vm13 = vcmask 872152   ;;  %vm305_vm14 = vmor %vm304_vm10, %vm303_vm9 }
  0x1b   : > { %v295_v5 = vld [vmem:[%s1722_s9] sm:$0xf]  ;;  %v349_v13 = vld [vmem:[%s1722_s9 + $0x4] sm:$0xf]  ;;  %vm312_vm15 = vcmask 216152   ;;  %vm319_vm0 = vcmask 412952  }
  0x1c   : > { %243 = vrot.lane.b32.xlu0 %v241_v4, %s1611_s13  ;;  %v274_v6 = vld [vmem:[%s1722_s9] sm:$0xf]  ;;  %v328_v14 = vld [vmem:[%s1722_s9 + $0x4] sm:$0xf]  ;;  %vm347_vm1 = vcmask 150552   ;;  %vm326_vm2 = vcmask 609752  }
  0x1d   : > { %269 = vrot.lane.b32.xlu1 %v267_v3, %s1610_s12  ;;  %v288_v7 = vld [vmem:[%s1722_s9] sm:$0xf]  ;;  %v356_v15 = vld [vmem:[%s1722_s9 + $0x4] sm:$0xf]  ;;  %v365_v41 = vld [vmem:[#allocation2 + $0x10] sm:$0xf] }
  0x1e   : > { %v281_v8 = vld [vmem:[%s1722_s9] sm:$0xf]  ;;  %v335_v16 = vld [vmem:[%s1722_s9 + $0x4] sm:$0xf]  ;;  %v228_v44 = vld [vmem:[%s2037_s1 + $0x8] sm:$0xf] }
  0x1f   : > { %vm2042_vm9 = vcmask 1039360   ;;  %vm736_vm10 = vcmask 850944   ;;  %s1633_s11 = smov 103   ;;  %s1430_s12 = smul.u32 384, %s1686_s22 }
  0x20   : > { %276 = vrot.lane.b32.xlu0 %v274_v6, %s1613_s15  ;;  %s1634_s22 = smov [#allocation3]  }
  0x21   : > { %297 = vrot.lane.b32.xlu1 %v295_v5, %s1612_s14 }
  0x24   : > { %283 = vrot.lane.b32.xlu0 %v281_v8, %s1615_s17 }
  0x25   : > { %290 = vrot.lane.b32.xlu1 %v288_v7, %s1614_s16  ;;  %s2001_s16 = scalar_lea.hbm %s2041_s5, %s1430_s12 }
  0x28   : > { %309 = vrot.lane.b32.xlu0 %v307_v10, %s1617_s25  ;;  %s1626_s25 = smov 126  }
  0x29   : > { %316 = vrot.lane.b32.xlu1 %v314_v9, %s1616_s23  ;;  %s1625_s23 = smov 127  }
  0x2c   : > { %323 = vrot.lane.b32.xlu0 %v321_v12, %s1619_s30  ;;  %s1628_s30 = smov 80  }
  0x2d   : > { %344 = vrot.lane.b32.xlu1 %v342_v11, %s1618_s26  ;;  %s1627_s26 = smov 104  }
  0x30   : > { %330 = vrot.lane.b32.xlu0 %v328_v14, %s1621_s7  ;;  %s1630_s7 = smov 53  }
  0x31   : > { %351 = vrot.lane.b32.xlu1 %v349_v13, %s1620_s6  ;;  %s1629_s6 = smov 29  }
  0x34   : > { %337 = vrot.lane.b32.xlu0 %v335_v16, %s1623_s10  ;;  %s1632_s10 = smov 70  }
  0x35   : > { %358 = vrot.lane.b32.xlu1 %v356_v15, %s1622_s8  ;;  %s1631_s8 = smov 109  }
  0x38   : > { %779 = vperm.xlu0 %1497, %v234_v17  }
  0x3c   : > { %681 = vperm.xlu0 %1497, %v233_v19  }
  0x8a   : > { %v258_v20 = vpop.permute.xlu0 %257 }
  0x8b   : > { %v251_v21 = vpop.permute.xlu1 %250  ;;  %v259_v22 = vrot.slane %v258_v20, 4 }
  0x8d   : > { %v261_v25 = vsel %vm260_vm4, %v259_v22, %v258_v20  ;;  %vm333_vm4 = vcmask 806552  }
  0x8e   : > { %v244_v24 = vpop.permute.xlu0 %243 }
  0x8f   : > { %v270_v23 = vpop.permute.xlu1 %269  ;;  %247 = vst.msk [vmem:[#allocation2] sm:$0xf] %vm246_vm3, %v244_v24  ;;  %vm354_vm3 = vcmask 347352  }
  0x90   : > { %254 = vst.msk [vmem:[#allocation2] sm:$0xf] %vm253_vm5, %v251_v21  ;;  %vm2043_vm5 = vcmask 1043456  }
  0x91   : > { %266 = vst.msk [vmem:[#allocation2] sm:$0xff] %vm265_vm6, %v261_v25  ;;  %vm371_vm6 = vcmask 31744  }
  0x92   : > { %273 = vst.msk [vmem:[#allocation2 + $0x4] sm:$0xf] %vm272_vm7, %v270_v23  ;;  %v277_v27 = vpop.permute.xlu0 %276  ;;  %vm361_vm7 = vcmask 544152  }
  0x93   : > { %v298_v26 = vpop.permute.xlu1 %297  ;;  %280 = vst.msk [vmem:[#allocation2 + $0x4] sm:$0xf] %vm279_vm8, %v277_v27  ;;  %vm340_vm8 = vcmask 1003352  }
  0x94   : > { %v299_v28 = vrot.slane %v298_v26, 4 }
  0x96   : > { %v284_v30 = vpop.permute.xlu0 %283  ;;  %v301_v31 = vsel %vm300_vm12, %v299_v28, %v298_v26  ;;  %vm764_vm12 = vcmask 654336  }
  0x97   : > { %v291_v29 = vpop.permute.xlu1 %290  ;;  %287 = vst.msk [vmem:[#allocation2 + $0x4] sm:$0xf] %vm286_vm11, %v284_v30  ;;  %vm666_vm11 = vcmask 1031168  }
  0x98   : > { %294 = vst.msk [vmem:[#allocation2 + $0x4] sm:$0xf] %vm293_vm13, %v291_v29 }
  0x99   : > { %306 = vst.msk [vmem:[#allocation2 + $0x4] sm:$0xff] %vm305_vm14, %v301_v31 }
  0x9a   : > { %v310_v33 = vpop.permute.xlu0 %309 }
  0x9b   : > { %v317_v32 = vpop.permute.xlu1 %316  ;;  %313 = vst.msk [vmem:[#allocation2 + $0x8] sm:$0xf] %vm312_vm15, %v310_v33  ;;  %vm847_vm15 = vcmask 236544  }
  0x9c   : > { %320 = vst.msk [vmem:[#allocation2 + $0x8] sm:$0xf] %vm319_vm0, %v317_v32  ;;  %vm1015_vm0 = vcmask 1045504  }
  0x9e   : > { %v324_v35 = vpop.permute.xlu0 %323 }
  0x9f   : > { %v345_v34 = vpop.permute.xlu1 %344  ;;  %327 = vst.msk [vmem:[#allocation2 + $0x8] sm:$0xf] %vm326_vm2, %v324_v35  ;;  %vm946_vm2 = vcmask 572416  }
  0xa0   : > { %348 = vst.msk [vmem:[#allocation2 + $0xc] sm:$0xf] %vm347_vm1, %v345_v34  ;;  %v363_v36 = vld [vmem:[#allocation2] sm:$0xff]  ;;  %vm890_vm1 = vcmask 891904  }
  0xa1   : > { %v369_v37 = vcombine.high %v363_v36, %v363_v36 }
  0xa2   : > { %v331_v39 = vpop.permute.xlu0 %330 }
  0xa3   : > { %v352_v38 = vpop.permute.xlu1 %351  ;;  %334 = vst.msk [vmem:[#allocation2 + $0x8] sm:$0xf] %vm333_vm4, %v331_v39  ;;  %1387 = vmatprep.subr.msk.mxu0 %vm2043_vm5, %v369_v37 }
  0xa4   : > { %355 = vst.msk [vmem:[#allocation2 + $0xc] sm:$0xf] %vm354_vm3, %v352_v38  ;;  %1388 = vmatpush1.msk.msra.mxu0 %vm2043_vm5, %v363_v36  ;;  %vm962_vm3 = vcmask 433152  }
  0xa5   : > { %1389 = vmatmul.mubr.msk.f32.vlgmr.msra.gmra.mxu0 %vm371_vm6, %v227_v40  ;;  %1424 = vmatprep.subr.msk.mxu0 %vm2043_vm5, %v365_v41 }
  0xa6   : > { %v338_v43 = vpop.permute.xlu0 %337  ;;  %459 = vmatprep.mubr.f32.mxu0 %v1607_v0  ;;  %1425 = vmatpush3.msk.msra.mxu0 %vm2043_vm5, %v365_v41 }
  0xa7   : > { %v359_v42 = vpop.permute.xlu1 %358  ;;  %341 = vst.msk [vmem:[#allocation2 + $0x8] sm:$0xf] %vm340_vm8, %v338_v43 }
  0xa8   : > { %362 = vst.msk [vmem:[#allocation2 + $0xc] sm:$0xf] %vm361_vm7, %v359_v42 }
  0xa9   : > { %1390 = vmatmul.mubr.msk.f32.gmra.mxu0 %vm371_vm6, %v228_v44 }
  0xaa   : > { %1426 = vmatprep.mubr.msk.f32.mxu0 %vm371_vm6, %v227_v40 }
  0xad   : > { %1427 = vmatmul.mubr.msk.f32.vlgmr.msra.gmra.mxu0 %vm371_vm6, %v228_v44 }
  0xae   : > { %1186 = vmatprep.mubr.f32.mxu0 %v1607_v0 }
  0xaf   : > { %v364_v45 = vld [vmem:[#allocation2 + $0x8] sm:$0xff] }
  0xb0   : > { %v370_v46 = vcombine.high %v364_v45, %v364_v45 }
  0xb2   : > { %1391 = vmatprep.subr.msk.mxu1 %vm2043_vm5, %v370_v46 }
  0xb3   : > { %1392 = vmatpush1.msk.msra.mxu1 %vm2043_vm5, %v364_v45  ;;  %v780_v14 = vpop.permute.xlu0 %779  ;;  %vm837_vm5 = vcmask 195584  }
  0xb4   : > { %1393 = vmatmul.mubr.msk.f32.vlgmr.msra.gmra.mxu1 %vm371_vm6, %v227_v40 }
  0xb5   : > { %536 = vmatprep.mubr.f32.mxu1 %v1607_v0 }
  0xb7   : > { %v1807_v15 = vpop.permute.xlu0 %681 }
  0xb8   : > { %1394 = vmatmul.mubr.msk.f32.gmra.mxu1 %vm371_vm6, %v228_v44 }
  0xb9   : > { %1097 = vmatprep.mubr.f32.mxu1 %v1607_v0 }
 0x165   : > { %v1771_v47 = vpop.f32.mrf.mxu0 }
 0x166   : > { %v623_v48 = vrot.slane %v1771_v47, 2  ;;  %v651_v13 = vrot.slane %v1771_v47, 4 }
 0x167   : > { %v1774_v49 = vpop.f32.mrf.mxu0 }
 0x168   : > { %628 = vrot.lane.b32.xlu0 %v623_v48, %s1625_s23  ;;  %v624_v50 = vrot.slane %v1774_v49, 2  ;;  %v652_v51 = vrot.slane %v1774_v49, 4 }
 0x169   : > { %v461_v52 = vpop.f32.mrf.mxu0 }
 0x16a   : > { %630 = vrot.lane.b32.xlu1 %v624_v50, %s1625_s23  ;;  %v721_v53 = vrot.slane %v461_v52, 2  ;;  %v749_v54 = vrot.slane %v461_v52, 4  ;;  %v781_v50 = vrot.slane %v780_v14, 2 }
 0x16b   : > { %v463_v55 = vpop.f32.mrf.mxu0 }
 0x16c   : > { %658 = vrot.lane.b32.xlu0 %v652_v51, %s1626_s25  ;;  %v722_v63 = vrot.slane %v463_v55, 2  ;;  %v750_v3 = vrot.slane %v463_v55, 4 }
 0x16d   : > { %v1428_v57 = vpop.f32.mrf.mxu0 }
 0x16e   : > { %726 = vrot.lane.b32.xlu1 %v721_v53, %s1627_s26  ;;  %v725_v61 = vrot.slane %v1428_v57, 2  ;;  %v753_v6 = vrot.slane %v1428_v57, 4 }
 0x16f   : > { %v609_v8 = vpop.f32.mrf.mxu0 }
 0x170   : > { %754 = vrot.lane.b32.xlu0 %v749_v54, %s1628_s30  ;;  %v655_v10 = vrot.slane %v609_v8, 4  ;;  %v627_v11 = vrot.slane %v609_v8, 2 }
 0x174   : > { %v1783_v56 = vpop.f32.mrf.mxu1 }
 0x175   : > { %v653_v58 = vrot.slane %v1783_v56, 4  ;;  %v625_v59 = vrot.slane %v1783_v56, 2 }
 0x176   : > { %v1787_v60 = vpop.f32.mrf.mxu1 }
 0x177   : > { %660 = vrot.lane.b32.xlu1 %v653_v58, %s1626_s25  ;;  %632 = vrot.lane.b32.xlu0 %v625_v59, %s1625_s23  ;;  %v626_v5 = vrot.slane %v1787_v60, 2  ;;  %v654_v7 = vrot.slane %v1787_v60, 4 }
 0x178   : > { %v538_v62 = vpop.f32.mrf.mxu1 }
 0x179   : > { %v751_v1 = vrot.slane %v538_v62, 4  ;;  %v723_v9 = vrot.slane %v538_v62, 2 }
 0x17a   : > { %v540_v2 = vpop.f32.mrf.mxu1 }
 0x17b   : > { %728 = vrot.lane.b32.xlu1 %v722_v63, %s1627_s26  ;;  %734 = vrot.lane.b32.xlu0 %v725_v61, %s1627_s26  ;;  %v724_v4 = vrot.slane %v540_v2, 2  ;;  %v752_v12 = vrot.slane %v540_v2, 4 }
 0x17f   : > { %756 = vrot.lane.b32.xlu1 %v750_v3, %s1628_s30  ;;  %758 = vrot.lane.b32.xlu0 %v751_v1, %s1628_s30 }
 0x183   : > { %634 = vrot.lane.b32.xlu1 %v626_v5, %s1625_s23  ;;  %732 = vrot.lane.b32.xlu0 %v724_v4, %s1627_s26 }
 0x187   : > { %762 = vrot.lane.b32.xlu1 %v753_v6, %s1628_s30  ;;  %662 = vrot.lane.b32.xlu0 %v654_v7, %s1626_s25 }
 0x18b   : > { %730 = vrot.lane.b32.xlu1 %v723_v9, %s1627_s26  ;;  %664 = vrot.lane.b32.xlu0 %v655_v10, %s1626_s25 }
 0x18f   : > { %636 = vrot.lane.b32.xlu1 %v627_v11, %s1625_s23 }
 0x193   : > { %760 = vrot.lane.b32.xlu1 %v752_v12, %s1628_s30 }
 0x197   : > { %656 = vrot.lane.b32.xlu1 %v651_v13, %s1626_s25 }
 0x1da   : > { %v629_v16 = vpop.permute.xlu0 %628 }
 0x1dc   : > { %v631_v17 = vpop.permute.xlu1 %630 }
 0x1dd   : > { %v639_v48 = vsel %vm2042_vm9, %v629_v16, %v631_v17 }
 0x1de   : > { %v659_v19 = vpop.permute.xlu0 %658  ;;  %v647_v53 = vadd.f32 %v639_v48, %v1771_v47 }
 0x1e0   : > { %v727_v20 = vpop.permute.xlu1 %726 }
 0x1e2   : > { %v755_v21 = vpop.permute.xlu0 %754 }
 0x1e9   : > { %v661_v22 = vpop.permute.xlu1 %660  ;;  %v633_v23 = vpop.permute.xlu0 %632 }
 0x1ea   : > { %v640_v31 = vsel %vm2042_vm9, %v631_v17, %v633_v23  ;;  %v668_v39 = vsel %vm666_vm11, %v659_v19, %v661_v22 }
 0x1eb   : > { %v648_v34 = vadd.f32 %v640_v31, %v1774_v49 }
 0x1ed   : > { %v729_v24 = vpop.permute.xlu1 %728  ;;  %v735_v25 = vpop.permute.xlu0 %734  ;;  %v676_v42 = vadd.f32 %v668_v39, %v648_v34 }
 0x1ee   : > { %v737_v36 = vsel %vm736_vm10, %v727_v20, %v729_v24 }
 0x1ef   : > { %v745_v43 = vadd.f32 %v737_v36, %v1771_v47  ;;  %v1820_v51 = vadd.f32 %v1807_v15, %v676_v42 }
 0x1f1   : > { %v757_v26 = vpop.permute.xlu1 %756  ;;  %v759_v27 = vpop.permute.xlu0 %758  ;;  %v1399_v59 = vmul.f32 -1.442695, %v1820_v51 }
 0x1f2   : > { %v765_v40 = vsel %vm764_vm12, %v755_v21, %v757_v26  ;;  %v766_v6 = vsel %vm764_vm12, %v757_v26, %v759_v27 }
 0x1f3   : > { %v773_v45 = vadd.f32 %v765_v40, %v745_v43  ;;  %1501 = vpow2.f32 %v1399_v59 }
 0x1f5   : > { %v635_v28 = vpop.permute.xlu1 %634  ;;  %v733_v29 = vpop.permute.xlu0 %732  ;;  %v1826_v54 = vadd.f32 %v781_v50, %v773_v45 }
 0x1f6   : > { %v641_v35 = vsel %vm2042_vm9, %v633_v23, %v635_v28  ;;  %v740_v11 = vsel %vm736_vm10, %v733_v29, %v735_v25 }
 0x1f7   : > { %v649_v41 = vadd.f32 %v641_v35, %v1783_v56  ;;  %v1402_v63 = vmul.f32 -1.442695, %v1826_v54  ;;  %v748_v17 = vadd.f32 %v740_v11, %v1787_v60 }
 0x1f9   : > { %v763_v30 = vpop.permute.xlu1 %762  ;;  %v663_v33 = vpop.permute.xlu0 %662 }
 0x1fa   : > { %v669_v37 = vsel %vm666_vm11, %v661_v22, %v663_v33 }
 0x1fb   : > { %v677_v44 = vadd.f32 %v669_v37, %v649_v41 }
 0x1fd   : > { %v731_v32 = vpop.permute.xlu1 %730  ;;  %v1823_v52 = vadd.f32 %v1807_v15, %v677_v44  ;;  %v665_v4 = vpop.permute.xlu0 %664 }
 0x1fe   : > { %v738_v62 = vsel %vm736_vm10, %v729_v24, %v731_v32  ;;  %v670_v8 = vsel %vm666_vm11, %v663_v33, %v665_v4  ;;  %v739_v10 = vsel %vm736_vm10, %v731_v32, %v733_v29 }
 0x1ff   : > { %v1400_v61 = vmul.f32 -1.442695, %v1823_v52  ;;  %v746_v47 = vadd.f32 %v738_v62, %v1774_v49  ;;  %v747_v14 = vadd.f32 %v739_v10, %v1783_v56 }
 0x200   : > { %v1502_v21 = vpop.eup %1501 }
 0x201   : > { %v637_v38 = vpop.permute.xlu1 %636  ;;  %1503 = vpow2.f32 %v1400_v61  ;;  %v774_v7 = vadd.f32 %v766_v6, %v746_v47  ;;  %v701_v56 = vadd.f32 1.0, %v1502_v21 }
 0x202   : > { %v642_v1 = vsel %vm2042_vm9, %v635_v28, %v637_v38  ;;  %1505 = vpow2.f32 %v1402_v63 }
 0x203   : > { %v650_v5 = vadd.f32 %v642_v1, %v1787_v60  ;;  %v1841_v12 = vadd.f32 %v781_v50, %v774_v7  ;;  %v235_v1 = vld [vmem:[%s2039_s3 + $0x4] sm:$0xff] }
 0x205   : > { %v761_v46 = vpop.permute.xlu1 %760  ;;  %v678_v9 = vadd.f32 %v670_v8, %v650_v5 }
 0x206   : > { %v767_v49 = vsel %vm764_vm12, %v759_v27, %v761_v46  ;;  %v768_v16 = vsel %vm764_vm12, %v761_v46, %v763_v30 }
 0x207   : > { %v1845_v13 = vadd.f32 %v1807_v15, %v678_v9  ;;  %v775_v20 = vadd.f32 %v767_v49, %v747_v14  ;;  %v776_v22 = vadd.f32 %v768_v16, %v748_v17  ;;  %v854_v49 = vlaneseq  ;;  %v1386_v14 = vld [vmem:[%s2040_s4 + $0x1] ss:$2 sm:$0xf] }
 0x208   : > { %vm240_vm14 = vcmp.gt.f32.partialorder %v1386_v14, 0.5 }
 0x209   : > { %v657_v55 = vpop.permute.xlu1 %656  ;;  %v1401_v23 = vmul.f32 -1.442695, %v1845_v13  ;;  %v785_v27 = vadd.f32 %v781_v50, %v775_v20  ;;  %v786_v28 = vadd.f32 %v781_v50, %v776_v22 }
 0x20a   : > { %v667_v57 = vsel %vm666_vm11, %v657_v55, %v659_v19  ;;  %v1403_v19 = vmul.f32 -1.442695, %v1841_v12 }
 0x20b   : > { %v675_v58 = vadd.f32 %v667_v57, %v647_v53  ;;  %v1404_v60 = vmul.f32 -1.442695, %v785_v27  ;;  %v1405_v31 = vmul.f32 -1.442695, %v786_v28 }
 0x20d   : > { %v684_v2 = vadd.f32 %v1807_v15, %v675_v58 }
 0x20e   : > { %v1504_v24 = vpop.eup %1503 }
 0x20f   : > { %v1398_v3 = vmul.f32 -1.442695, %v684_v2  ;;  %v1506_v25 = vpop.eup %1505  ;;  %v702_v15 = vadd.f32 1.0, %v1504_v24 }
 0x210   : > { %v799_v30 = vadd.f32 1.0, %v1506_v25 }
 0x211   : > { %1507 = vpow2.f32 %v1398_v3 }
 0x212   : > { %1509 = vpow2.f32 %v1403_v19  ;;  %v855_v19 = vshrl.u32 %v854_v49, 7 }
 0x213   : > { %1511 = vpow2.f32 %v1401_v23 }
 0x214   : > { %v856_v22 = vsub.s32 0, %v855_v19  ;;  %v868_v23 = vsub.s32 3, %v855_v19  ;;  %v860_v24 = vsub.s32 1, %v855_v19 }
 0x21e   : > { %v1508_v26 = vpop.eup %1507 }
 0x21f   : > { %v700_v29 = vadd.f32 1.0, %v1508_v26  ;;  %v1510_v32 = vpop.eup %1509  ;;  %v917_v26 = vsel %vm240_vm14, 1, %v1624_v18 }
 0x220   : > { %v1512_v33 = vpop.eup %1511  ;;  %v800_v35 = vadd.f32 1.0, %v1510_v32  ;;  %v925_v32 = vrot.slane %v917_v26, %v860_v24 }
 0x221   : > { %1513 = vrcp.f32 %v700_v29  ;;  %v703_v37 = vadd.f32 1.0, %v1512_v33 }
 0x222   : > { %1515 = vrcp.f32 %v702_v15 }
 0x223   : > { %1517 = vrcp.f32 %v701_v56  ;;  %v921_v56 = vrot.slane %v917_v26, %v856_v22 }
 0x224   : > { %1519 = vrcp.f32 %v799_v30 }
 0x225   : > { %1521 = vpow2.f32 %v1404_v60  ;;  %vm934_vm6 = vcmp.eq.s32.totalorder %v921_v56, 1 }
 0x226   : > { %1523 = vpow2.f32 %v1405_v31 }
 0x227   : > { %1525 = vrcp.f32 %v800_v35 }
 0x228   : > { %1527 = vrcp.f32 %v703_v37 }
 0x22e   : > { %v1514_v34 = vpop.eup %1513 }
 0x22f   : > { %v712_v36 = vmul.f32 %v1514_v34, %v684_v2  ;;  %v1516_v38 = vpop.eup %1515  ;;  %v933_v34 = vrot.slane %v917_v26, %v868_v23 }
 0x230   : > { %v1518_v39 = vpop.eup %1517  ;;  %v714_v42 = vmul.f32 %v1516_v38, %v1823_v52 }
 0x231   : > { %822 = vrot.lane.b32.xlu0 %v712_v36, %s1627_s26  ;;  %839 = vrot.lane.b32.xlu1 %v712_v36, %s1629_s6  ;;  %v1520_v40 = vpop.eup %1519  ;;  %v713_v48 = vmul.f32 %v1518_v39, %v1820_v51  ;;  %vm937_vm9 = vcmp.eq.s32.totalorder %v933_v34, 1  ;;  %v232_v34 = vld [vmem:[%s2038_s2 + $0x18] sm:$0xff] }
 0x232   : > { %v1522_v41 = vpop.eup %1521  ;;  %v811_v45 = vmul.f32 %v1520_v40, %v1826_v54 }
 0x233   : > { %v1524_v43 = vpop.eup %1523  ;;  %v801_v44 = vadd.f32 1.0, %v1522_v41 }
 0x234   : > { %v802_v46 = vadd.f32 1.0, %v1524_v43  ;;  %v878_v50 = vrot.slane %v811_v45, 6  ;;  %v1526_v52 = vpop.eup %1525 }
 0x235   : > { %851 = vrot.lane.b32.xlu1 %v712_v36, %s1630_s7  ;;  %843 = vrot.lane.b32.xlu0 %v714_v42, %s1629_s6  ;;  %1529 = vrcp.f32 %v801_v44  ;;  %v1528_v53 = vpop.eup %1527  ;;  %v812_v51 = vmul.f32 %v1526_v52, %v1841_v12 }
 0x236   : > { %1531 = vrcp.f32 %v802_v46  ;;  %v715_v54 = vmul.f32 %v1528_v53, %v1845_v13  ;;  %v236_v13 = vld [vmem:[%s2040_s4] ss:$2 sm:$0xf] }
 0x237   : > { %v879_v57 = vrot.slane %v812_v51, 6  ;;  %vm237_vm13 = vcmp.gt.f32.partialorder %v236_v13, 0.5 }
 0x238   : > { %v853_v25 = vsel %vm237_vm13, 1, %v1624_v18  ;;  %vm935_vm13 = vcmp.eq.s32.totalorder %v925_v32, 1  ;;  %v230_v32 = vld [vmem:[%s2038_s2 + $0x8] sm:$0xff] }
 0x239   : > { %841 = vrot.lane.b32.xlu1 %v713_v48, %s1629_s6  ;;  %826 = vrot.lane.b32.xlu0 %v714_v42, %s1627_s26  ;;  %v857_v29 = vrot.slane %v853_v25, %v856_v22  ;;  %v869_v30 = vrot.slane %v853_v25, %v868_v23  ;;  %v861_v60 = vrot.slane %v853_v25, %v860_v24 }
 0x23b   : > { %vm870_vm4 = vcmp.eq.s32.totalorder %v857_v29, 1  ;;  %vm873_vm7 = vcmp.eq.s32.totalorder %v869_v30, 1  ;;  %vm871_vm8 = vcmp.eq.s32.totalorder %v861_v60, 1 }
 0x23d   : > { %824 = vrot.lane.b32.xlu1 %v713_v48, %s1627_s26  ;;  %882 = vrot.lane.b32.xlu0 %v878_v50, %s1631_s8 }
 0x241   : > { %938 = vrot.lane.b32.xlu1 %v878_v50, %s1632_s10  ;;  %898 = vrot.lane.b32.xlu0 %v878_v50, %s1626_s25 }
 0x242   : > { %v1530_v55 = vpop.eup %1529 }
 0x243   : > { %v1532_v58 = vpop.eup %1531  ;;  %v813_v59 = vmul.f32 %v1530_v55, %v785_v27  ;;  %v864_v27 = vsub.s32 2, %v855_v19 }
 0x244   : > { %v814_v61 = vmul.f32 %v1532_v58, %v786_v28 }
 0x245   : > { %954 = vrot.lane.b32.xlu1 %v878_v50, %s1630_s7  ;;  %845 = vrot.lane.b32.xlu0 %v715_v54, %s1629_s6  ;;  %v880_v62 = vrot.slane %v813_v59, 6  ;;  %v865_v31 = vrot.slane %v853_v25, %v864_v27  ;;  %v929_v33 = vrot.slane %v917_v26, %v864_v27 }
 0x246   : > { %v881_v63 = vrot.slane %v814_v61, 6 }
 0x247   : > { %vm872_vm12 = vcmp.eq.s32.totalorder %v865_v31, 1  ;;  %vm936_vm14 = vcmp.eq.s32.totalorder %v929_v33, 1  ;;  %v231_v33 = vld [vmem:[%s2038_s2 + $0x10] sm:$0xff] }
 0x249   : > { %884 = vrot.lane.b32.xlu1 %v879_v57, %s1631_s8  ;;  %940 = vrot.lane.b32.xlu0 %v879_v57, %s1632_s10 }
 0x24d   : > { %900 = vrot.lane.b32.xlu1 %v879_v57, %s1626_s25  ;;  %956 = vrot.lane.b32.xlu0 %v879_v57, %s1630_s7 }
 0x251   : > { %888 = vrot.lane.b32.xlu1 %v881_v63, %s1631_s8  ;;  %886 = vrot.lane.b32.xlu0 %v880_v62, %s1631_s8 }
 0x255   : > { %904 = vrot.lane.b32.xlu1 %v881_v63, %s1626_s25  ;;  %902 = vrot.lane.b32.xlu0 %v880_v62, %s1626_s25 }
 0x259   : > { %942 = vrot.lane.b32.xlu1 %v880_v62, %s1632_s10  ;;  %944 = vrot.lane.b32.xlu0 %v881_v63, %s1632_s10 }
 0x25d   : > { %958 = vrot.lane.b32.xlu1 %v880_v62, %s1630_s7  ;;  %960 = vrot.lane.b32.xlu0 %v881_v63, %s1630_s7 }
 0x261   : > { %816 = vrot.lane.b32.xlu1 %v715_v54, %s1628_s30  ;;  %828 = vrot.lane.b32.xlu0 %v715_v54, %s1627_s26  ;;  %s1549_s30 = sshll.u32 %s1634_s22, 4  ;;  %s1550_s30 = int_to_ptr.vmem [resolvable:$false] %s1549_s30 }
 0x262   : > { %s1551_s6 = scalar_lea.vmem %s1550_s30, 768 }
 0x265   : > { %1276 = vperm.xlu1 %1498, %v235_v1  }
 0x2a3   : > { %v840_v2 = vpop.permute.xlu1 %839  ;;  %v1878_v47 = vpop.permute.xlu0 %822 }
 0x2a7   : > { %v1880_v3 = vpop.permute.xlu1 %851  ;;  %v1882_v4 = vpop.permute.xlu0 %843 }
 0x2a8   : > { %v977_v39 = vrot.slane %v1880_v3, 6 }
 0x2ab   : > { %v842_v5 = vpop.permute.xlu1 %841  ;;  %v1884_v6 = vpop.permute.xlu0 %826 }
 0x2ac   : > { %v848_v18 = vsel %vm847_vm15, %v840_v2, %v842_v5  ;;  %v849_v38 = vsel %vm847_vm15, %v842_v5, %v1882_v4 }
 0x2ad   : > { %v974_v44 = vrot.slane %v848_v18, 6  ;;  %v975_v50 = vrot.slane %v849_v38, 6 }
 0x2af   : > { %v1886_v7 = vpop.permute.xlu1 %824  ;;  %v1888_v8 = vpop.permute.xlu0 %882 }
 0x2b0   : > { %v830_v52 = vsel %vm736_vm10, %v1878_v47, %v1886_v7  ;;  %v831_v53 = vsel %vm736_vm10, %v1886_v7, %v1884_v6 }
 0x2b3   : > { %v1890_v9 = vpop.permute.xlu1 %938  ;;  %v899_v10 = vpop.permute.xlu0 %898 }
 0x2b7   : > { %v955_v11 = vpop.permute.xlu1 %954  ;;  %v846_v12 = vpop.permute.xlu0 %845 }
 0x2b8   : > { %v850_v51 = vsel %vm847_vm15, %v1882_v4, %v846_v12  ;;  %vm2047_vm15 = vcmask 1043456  }
 0x2bb   : > { %v885_v16 = vpop.permute.xlu1 %884  ;;  %v1898_v17 = vpop.permute.xlu0 %940 }
 0x2bc   : > { %v891_v54 = vsel %vm890_vm1, %v1888_v8, %v885_v16  ;;  %v947_v55 = vsel %vm946_vm2, %v1890_v9, %v1898_v17  ;;  %v976_v8 = vrot.slane %v850_v51, 6 }
 0x2bf   : > { %v901_v20 = vpop.permute.xlu1 %900  ;;  %v957_v21 = vpop.permute.xlu0 %956 }
 0x2c0   : > { %v906_v40 = vsel %vm666_vm11, %v899_v10, %v901_v20  ;;  %v963_v45 = vsel %vm962_vm3, %v955_v11, %v957_v21 }
 0x2c1   : > { %v913_v57 = vsel %vm870_vm4, %v891_v54, %v906_v40  ;;  %v970_v59 = vsel %vm934_vm6, %v947_v55, %v963_v45  ;;  %vm1020_vm6 = vcmask 64512  }
 0x2c2   : > { %v986_v11 = vrot.slane %v913_v57, 4  ;;  %v998_v12 = vrot.slane %v970_v59, 2 }
 0x2c3   : > { %v889_v15 = vpop.permute.xlu1 %888  ;;  %v887_v28 = vpop.permute.xlu0 %886 }
 0x2c4   : > { %v892_v41 = vsel %vm890_vm1, %v885_v16, %v887_v28  ;;  %v893_v58 = vsel %vm890_vm1, %v887_v28, %v889_v15 }
 0x2c7   : > { %v905_v35 = vpop.permute.xlu1 %904  ;;  %v903_v36 = vpop.permute.xlu0 %902 }
 0x2c8   : > { %v907_v37 = vsel %vm666_vm11, %v901_v20, %v903_v36  ;;  %v908_v46 = vsel %vm666_vm11, %v903_v36, %v905_v35  ;;  %v916_v61 = vsel %vm873_vm7, %v889_v15, %v905_v35  ;;  %vm2046_vm11 = vcmask 1041408  }
 0x2c9   : > { %v914_v48 = vsel %vm871_vm8, %v892_v41, %v907_v37  ;;  %v915_v62 = vsel %vm872_vm12, %v893_v58, %v908_v46  ;;  %v1008_v7 = vsel %vm2046_vm11, %v831_v53, %v975_v50  ;;  %v989_v14 = vrot.slane %v916_v61, 4 }
 0x2ca   : > { %v987_v63 = vrot.slane %v914_v48, 4  ;;  %v988_v16 = vrot.slane %v915_v62, 4  ;;  %vm1264_vm7 = vcmask 842752  }
 0x2cb   : > { %v943_v42 = vpop.permute.xlu1 %942  ;;  %v945_v43 = vpop.permute.xlu0 %944 }
 0x2cc   : > { %v948_v47 = vsel %vm946_vm2, %v1898_v17, %v943_v42  ;;  %v949_v9 = vsel %vm946_vm2, %v943_v42, %v945_v43 }
 0x2cf   : > { %v959_v1 = vpop.permute.xlu1 %958  ;;  %v961_v2 = vpop.permute.xlu0 %960 }
 0x2d0   : > { %v964_v3 = vsel %vm962_vm3, %v957_v21, %v959_v1  ;;  %v965_v4 = vsel %vm962_vm3, %v959_v1, %v961_v2  ;;  %v973_v5 = vsel %vm937_vm9, %v945_v43, %v961_v2  ;;  %v1012_v21 = vsel %vm2047_vm15, %v1008_v7, %v987_v63  ;;  %vm2048_vm9 = vmmov %vm2046_vm11 }
 0x2d1   : > { %v971_v10 = vsel %vm935_vm13, %v948_v47, %v964_v3  ;;  %v972_v13 = vsel %vm936_vm14, %v949_v9, %v965_v4  ;;  %v1001_v17 = vrot.slane %v973_v5, 2  ;;  %vm2049_vm1 = vmmov %vm2048_vm9 }
 0x2d2   : > { %v999_v49 = vrot.slane %v971_v10, 2  ;;  %v1000_v26 = vrot.slane %v972_v13, 2  ;;  %vm2050_vm2 = vmmov %vm2049_vm1 }
 0x2d3   : > { %v817_v19 = vpop.permute.xlu1 %816  ;;  %v829_v20 = vpop.permute.xlu0 %828  ;;  %vm2051_vm3 = vmmov %vm2047_vm15 }
 0x2d4   : > { %v838_v22 = vsel %vm837_vm5, %v817_v19, %v830_v52  ;;  %v832_v23 = vsel %vm736_vm10, %v1884_v6, %v829_v20  ;;  %v1010_v24 = vsel %vm2048_vm9, %v829_v20, %v977_v39  ;;  %v1017_v25 = vsel %vm1015_vm0, %v1012_v21, %v999_v49  ;;  %vm2052_vm4 = vmmov %vm2051_vm3  ;;  %v229_v6 = vld [vmem:[%s2038_s2] sm:$0xff] }
 0x2d5   : > { %v1007_v27 = vsel %vm2049_vm1, %v838_v22, %v974_v44  ;;  %v1009_v15 = vsel %vm2050_vm2, %v832_v23, %v976_v8  ;;  %1063 = vmatprep.subr.mxu1 %v1017_v25  ;;  %v1014_v28 = vsel %vm2051_vm3, %v1010_v24, %v989_v14  ;;  %vm2053_vm5 = vmmov %vm2051_vm3 }
 0x2d6   : > { %v1019_v29 = vsel %vm1015_vm0, %v1014_v28, %v1001_v17  ;;  %v1011_v56 = vsel %vm2052_vm4, %v1007_v27, %v986_v11  ;;  %v1013_v30 = vsel %vm2053_vm5, %v1009_v15, %v988_v16 }
 0x2d7   : > { %1152 = vmatprep.subr.mxu0 %v1019_v29  ;;  %v1016_v60 = vsel %vm1015_vm0, %v1011_v56, %v998_v12  ;;  %v1018_v31 = vsel %vm1015_vm0, %v1013_v30, %v1000_v26  ;;  %vm2054_vm0 = vcmask 1039360  }
 0x2d8   : > { %1064 = vmatpush1.msra.mxu1 %v1016_v60  ;;  %1153 = vmatpush1.msra.mxu0 %v1018_v31  ;;  %vm2055_vm8 = vmmov %vm2054_vm0 }
 0x2d9   : > { %1410 = vmatmul.mubr.msk.f32.vlgmr.msra.gmra.mxu0 %vm1020_vm6, %v229_v6  ;;  %1406 = vmatmul.mubr.msk.f32.vlgmr.msra.gmra.mxu1 %vm1020_vm6, %v229_v6  ;;  %vm2056_vm12 = vmmov %vm2054_vm0 }
 0x2da   : > { %1191 = vmatprep.mubr.f32.mxu0 %v1607_v0  ;;  %1103 = vmatprep.mubr.f32.mxu1 %v1607_v0 }
 0x2dd   : > { %1411 = vmatmul.mubr.msk.f32.gmra.mxu0 %vm1020_vm6, %v230_v32  ;;  %1407 = vmatmul.mubr.msk.f32.gmra.mxu1 %vm1020_vm6, %v230_v32 }
 0x2de   : > { %1197 = vmatprep.mubr.f32.mxu0 %v1607_v0  ;;  %1109 = vmatprep.mubr.f32.mxu1 %v1607_v0 }
 0x2e0   : > { %v1277_v52 = vpop.permute.xlu1 %1276 }
 0x2e1   : > { %1412 = vmatmul.mubr.msk.f32.gmra.mxu0 %vm1020_vm6, %v231_v33  ;;  %1408 = vmatmul.mubr.msk.f32.gmra.mxu1 %vm1020_vm6, %v231_v33 }
 0x2e2   : > { %1115 = vmatprep.mubr.f32.mxu1 %v1607_v0  ;;  %1203 = vmatprep.mubr.f32.mxu0 %v1607_v0 }
 0x2e5   : > { %1409 = vmatmul.mubr.msk.f32.gmra.mxu1 %vm1020_vm6, %v232_v34  ;;  %1413 = vmatmul.mubr.msk.f32.gmra.mxu0 %vm1020_vm6, %v232_v34 }
 0x399   : > { %v1188_v35 = vpop.f32.mrf.mxu0  ;;  %v1099_v36 = vpop.f32.mrf.mxu1 }
 0x39b   : > { %v1190_v18 = vpop.f32.mrf.mxu0  ;;  %v1101_v37 = vpop.f32.mrf.mxu1 }
 0x39d   : > { %v1193_v38 = vpop.f32.mrf.mxu0  ;;  %v1105_v39 = vpop.f32.mrf.mxu1 }
 0x39e   : > { %1218 = vrot.lane.b32.xlu1 %v1193_v38, %s1625_s23 }
 0x39f   : > { %v1195_v40 = vpop.f32.mrf.mxu0  ;;  %v1107_v41 = vpop.f32.mrf.mxu1 }
 0x3a0   : > { %1220 = vrot.lane.b32.xlu0 %v1195_v40, %s1625_s23 }
 0x3a1   : > { %v1111_v42 = vpop.f32.mrf.mxu1  ;;  %v1199_v0 = vpop.f32.mrf.mxu0 }
 0x3a2   : > { %1214 = vrot.lane.b32.xlu1 %v1105_v39, %s1625_s23 }
 0x3a3   : > { %v1113_v43 = vpop.f32.mrf.mxu1  ;;  %v1201_v44 = vpop.f32.mrf.mxu0 }
 0x3a4   : > { %1216 = vrot.lane.b32.xlu0 %v1107_v41, %s1625_s23  ;;  %s215_s23 = sand.u32 1, %s1597_s19  }
 0x3a5   : > { %v1117_v45 = vpop.f32.mrf.mxu1  ;;  %v1205_v48 = vpop.f32.mrf.mxu0  ;;  %s1307_s17 = scalar_lea.sflag [#allocation4], %s215_s23 }
 0x3a6   : > { %1239 = vrot.lane.b32.xlu1 %v1199_v0, %s1627_s26 }
 0x3a7   : > { %v1119_v46 = vpop.f32.mrf.mxu1  ;;  %v1207_v50 = vpop.f32.mrf.mxu0 }
 0x3a8   : > { %1241 = vrot.lane.b32.xlu0 %v1201_v44, %s1627_s26 }
 0x3aa   : > { %1235 = vrot.lane.b32.xlu1 %v1111_v42, %s1627_s26 }
 0x3ac   : > { %1237 = vrot.lane.b32.xlu0 %v1113_v43, %s1627_s26  ;;  %s1429_s26 = smul.u32 24, %s215_s23 }
 0x3ae   : > { %1258 = vrot.lane.b32.xlu1 %v1119_v46, %s1633_s11  ;;  %s217_s13 = scalar_lea.vmem [#allocation3], %s1429_s26 }
 0x3af   : > { %s1321_s14 = sshll.u32 %s217_s13, 4  ;;  %s1322_s14 = int_to_ptr.vmem [resolvable:$true] %s1321_s14 }
 0x3b0   : > { %1256 = vrot.lane.b32.xlu0 %v1117_v45, %s1633_s11  ;;  %s1545_s25 = scalar_lea.vmem %s1322_s14, 384  ;;  %p1552_p0 = scmp.lt.s32.totalorder %s1322_s14, %s1550_s30 }
 0x3b1   : > { %p1546_p11 = scmp.ne.s32.totalorder %s1322_s14, %s1545_s25  ;;  %p1553_p1 = scmp.lt.s32.totalorder %s1551_s6, %s1545_s25 }
 0x3b2   : > { %1262 = vrot.lane.b32.xlu1 %v1207_v50, %s1633_s11 }
 0x3b3   : > { %p1547_p12 = pnand %p1546_p11, %p1703_p5  ;;  %p1554_p2 = por %p1553_p1, %p1552_p0 }
 0x3b4   : > { %1260 = vrot.lane.b32.xlu0 %v1205_v48, %s1633_s11 }
 0x3b5   : > { %p1548_p13 = pneg %p1547_p12 }
 0x3b7   : > { %p1555_p3 = pnand %p1554_p2, %p1548_p13 }
 0x410   : > { %v1219_v53 = vpop.permute.xlu1 %1218 }
 0x412   : > { %v1221_v54 = vpop.permute.xlu0 %1220 }
 0x413   : > { %v1224_v47 = vsel %vm2055_vm8, %v1219_v53, %v1221_v54 }
 0x414   : > { %v1215_v51 = vpop.permute.xlu1 %1214  ;;  %v1230_v10 = vadd.f32 %v1224_v47, %v1188_v35 }
 0x416   : > { %v1217_v55 = vpop.permute.xlu0 %1216 }
 0x417   : > { %v1222_v61 = vsel %vm2054_vm0, %v1215_v51, %v1217_v55  ;;  %v1223_v3 = vsel %vm2056_vm12, %v1217_v55, %v1219_v53 }
 0x418   : > { %v1240_v57 = vpop.permute.xlu1 %1239  ;;  %v1228_v1 = vadd.f32 %v1222_v61, %v1099_v36  ;;  %v1229_v11 = vadd.f32 %v1223_v3, %v1101_v37 }
 0x41a   : > { %v1242_v58 = vpop.permute.xlu0 %1241 }
 0x41b   : > { %v1245_v7 = vsel %vm736_vm10, %v1240_v57, %v1242_v58 }
 0x41c   : > { %v1236_v59 = vpop.permute.xlu1 %1235  ;;  %v1251_v49 = vadd.f32 %v1245_v7, %v1230_v10 }
 0x41e   : > { %v1238_v62 = vpop.permute.xlu0 %1237 }
 0x41f   : > { %v1243_v63 = vsel %vm736_vm10, %v1236_v59, %v1238_v62  ;;  %v1244_v8 = vsel %vm736_vm10, %v1238_v62, %v1240_v57 }
 0x420   : > { %v1259_v2 = vpop.permute.xlu1 %1258  ;;  %v1249_v4 = vadd.f32 %v1243_v63, %v1228_v1  ;;  %v1250_v13 = vadd.f32 %v1244_v8, %v1229_v11 }
 0x422   : > { %v1257_v5 = vpop.permute.xlu0 %1256 }
 0x423   : > { %v1265_v9 = vsel %vm1264_vm7, %v1257_v5, %v1259_v2 }
 0x424   : > { %v1271_v12 = vadd.f32 %v1265_v9, %v1249_v4  ;;  %v1263_v17 = vpop.permute.xlu1 %1262 }
 0x426   : > { %v1279_v14 = vadd.f32 %v1277_v52, %v1271_v12  ;;  %v1261_v16 = vpop.permute.xlu0 %1260 }
 0x427   : > { %v1266_v19 = vsel %vm1264_vm7, %v1259_v2, %v1261_v16  ;;  %v1267_v20 = vsel %vm1264_vm7, %v1261_v16, %v1263_v17 }
 0x428   : > { %v1414_v21 = vmul.f32 -1.442695, %v1279_v14  ;;  %v1272_v22 = vadd.f32 %v1266_v19, %v1250_v13  ;;  %v1273_v23 = vadd.f32 %v1267_v20, %v1251_v49 }
 0x42a   : > { %1533 = vpow2.f32 %v1414_v21  ;;  %v1280_v24 = vadd.f32 %v1277_v52, %v1272_v22  ;;  %v1281_v25 = vadd.f32 %v1277_v52, %v1273_v23 }
 0x42c   : > { %v1415_v26 = vmul.f32 -1.442695, %v1280_v24  ;;  %v1416_v27 = vmul.f32 -1.442695, %v1281_v25 }
 0x42e   : > { %1535 = vpow2.f32 %v1415_v26 }
 0x42f   : > { %1537 = vpow2.f32 %v1416_v27 }
 0x437   : > { %v1534_v15 = vpop.eup %1533 }
 0x438   : > { %v1291_v28 = vadd.f32 1.0, %v1534_v15 }
 0x43a   : > { %1539 = vrcp.f32 %v1291_v28 }
 0x43b   : > { %v1536_v29 = vpop.eup %1535 }
 0x43c   : > { %v1538_v56 = vpop.eup %1537  ;;  %v1292_v30 = vadd.f32 1.0, %v1536_v29 }
 0x43d   : > { %v1293_v6 = vadd.f32 1.0, %v1538_v56 }
 0x43e   : > { %1541 = vrcp.f32 %v1292_v30 }
 0x43f   : > { %1543 = vrcp.f32 %v1293_v6 }
 0x447   : > { %v1540_v60 = vpop.eup %1539 }
 0x448   : > { %v1300_v31 = vmul.f32 %v1540_v60, %v1279_v14 }
 0x44a   : > { %1303 = vst [vmem:[%s217_s13] sm:$0xff] %v1300_v31 }
 0x44b   : > { %v1542_v32 = vpop.eup %1541 }
 0x44c   : > { %v1544_v33 = vpop.eup %1543  ;;  %v1301_v34 = vmul.f32 %v1542_v32, %v1280_v24 }
 0x44d   : > { %v1302_v35 = vmul.f32 %v1544_v33, %v1281_v25 }
 0x44e   : > { %1304 = vst [vmem:[%s217_s13 + $0x8] sm:$0xff] %v1301_v34 }
 0x44f   : > { %1305 = vst [vmem:[%s217_s13 + $0x10] sm:$0xff] %v1302_v35 }
 0x450   : > { %1558 = shalt.err (!%p1555_p3)
}
 0x451   : > { %s1559_s7 = scalar_lea.hbm %s2001_s16, 384  ;;  %s1563_s11 = scalar_lea.hbm %s2041_s5, 768 }
 0x452   : > { %p1560_p4 = scmp.ne.s32.totalorder %s2001_s16, %s1559_s7  ;;  %p1564_p9 = scmp.lt.s32.totalorder %s2001_s16, %s2041_s5 }
 0x453   : > { %p1565_p10 = scmp.lt.s32.totalorder %s1563_s11, %s1559_s7 }
 0x454   : > { %p1561_p7 = pnand %p1560_p4, %p1703_p5 }
 0x455   : > { %p1566_p11 = por %p1565_p10, %p1564_p9 }
 0x456   : > { %p1562_p8 = pneg %p1561_p7 }
 0x458   : > { %p1567_p12 = pnand %p1566_p11, %p1562_p8 }
 0x45a   : > { %1570 = shalt.err (!%p1567_p12)
}
 0x45b   : > { %1431 = dma.vmem_to_hbm [thread:$0]  (%p1703_p5), %s1322_s14, 384, %s2001_s16, %s1307_s17  }
 0x45c PF: > { %p1437_p13 = scmp.ge.s32.totalorder %s1605_s21, 2  ;;  %s1333_s12 = sand.u32 1, %s1593_s18  }
 0x45d   : > { %s1334_s13 = scalar_lea.sflag [#allocation4], %s1333_s12 }
 0x45e   : > { %p1434_p0 = pnand %p1437_p13, %p1707_p6 }
 0x460   : > { %p1435_p1 = pneg %p1434_p0 }
 0x462   : > { %1588 = dma.done.wait (%p1435_p1), %s1334_s13, 384  }
 0x463   : > { %1590 = vsyncadd (%p1435_p1), %s1334_s13, 4294966912  ;;  %p15_p2 = scmp.ge.s32.totalorder %s1690_s24, 4   ;;  %s2057_s18 = smov %s1597_s19 }
 0x464   : > { %s2058_s19 = smov %s1601_s20  ;;  %s2059_s20 = smov %s1701_s27 }
 0x465   : > { %s2060_s21 = smov %s1690_s24  ;;  %17 = sbr.rel (!%p15_p2) target bundleno = 3 (0x3), region = 76 }
 0x46a   :  { %1339 = vsyncpa [#allocation4], 1 }
 0x46b   :  { %1341 = vsyncpa [#allocation4 + $0x1], 1 }

</bundles_post_ra>
